<compile_context>
chip_gen: v7x
topology: tpu7x:2x2x1
jax: 0.10.0
libtpu: 0.0.40
codegen_flags: <defaults>
</compile_context>

<pallas_src>
import jax
import jax.numpy as jnp
from jax.experimental import pallas as pl
from jax.experimental.pallas import tpu as pltpu


def _round_up(n, m):
    return (n + m - 1) // m * m


def dqn_mlp_kernel(x_ref, w1_ref, b1_ref, w2_ref, b2_ref, w3_ref, b3_ref, o_ref):
    # Layer 1: bf16 MXU matmul with f32 accumulation; bias + ReLU on the VPU in f32.
    h1 = jnp.dot(x_ref[...], w1_ref[...], preferred_element_type=jnp.float32)
    h1 = jnp.maximum(h1 + b1_ref[...], 0.0).astype(jnp.bfloat16)
    # Layer 2
    h2 = jnp.dot(h1, w2_ref[...], preferred_element_type=jnp.float32)
    h2 = jnp.maximum(h2 + b2_ref[...], 0.0).astype(jnp.bfloat16)
    # Layer 3 (no activation); output block is lane-dense (padded to 128 cols).
    o = jnp.dot(h2, w3_ref[...], preferred_element_type=jnp.float32)
    o_ref[...] = (o + b3_ref[...]).astype(o_ref.dtype)


def init_params(key, input_size, output_size):
    """Deterministic init matching PyTorch nn.Linear default
    (uniform in [-1/sqrt(fan_in), 1/sqrt(fan_in)]). Weights stored as
    [in_features, out_features] so the kernel computes x @ W + b."""
    dims = [(input_size, 400), (400, 300), (300, output_size)]
    params = []
    keys = jax.random.split(key, 2 * len(dims))
    for i, (fan_in, fan_out) in enumerate(dims):
        bound = 1.0 / float(jnp.sqrt(jnp.float32(fan_in)))
        w = jax.random.uniform(keys[2 * i], (fan_in, fan_out),
                               minval=-bound, maxval=bound, dtype=jnp.float32)
        b = jax.random.uniform(keys[2 * i + 1], (1, fan_out),
                               minval=-bound, maxval=bound, dtype=jnp.float32)
        params += [w, b]
    return tuple(params)


def prepare_params(params):
    """One-time lane-alignment of the parameters: zero-pad every dim to a
    multiple of 128 and cast weights to bf16 (biases stay f32 for the
    f32 bias-add / ReLU on the VPU)."""
    w1, b1, w2, b2, w3, b3 = params

    def pad2(a, rows, cols):
        return jnp.pad(a, ((0, rows - a.shape[0]), (0, cols - a.shape[1])))

    in_p = _round_up(w1.shape[0], 128)   # 8   -> 128
    h1_p = _round_up(w1.shape[1], 128)   # 400 -> 512
    h2_p = _round_up(w2.shape[1], 128)   # 300 -> 384
    out_p = _round_up(w3.shape[1], 128)  # 4   -> 128

    return (
        pad2(w1, in_p, h1_p).astype(jnp.bfloat16),
        pad2(b1, 1, h1_p).astype(jnp.float32),
        pad2(w2, h1_p, h2_p).astype(jnp.bfloat16),
        pad2(b2, 1, h2_p).astype(jnp.float32),
        pad2(w3, h2_p, out_p).astype(jnp.bfloat16),
        pad2(b3, 1, out_p).astype(jnp.float32),
    )


def dqn_forward(x, padded_params, output_size):
    """Fused 3-layer MLP forward. `padded_params` comes from prepare_params.
    Returns [batch, output_size] float32 (same semantics as the PyTorch module)."""
    w1, b1, w2, b2, w3, b3 = padded_params
    batch, in_features = x.shape
    in_p, h1_p = w1.shape
    h2_p = w2.shape[1]
    out_p = w3.shape[1]

    # Pad batch to a sublane multiple; tile it over a parallel grid if large.
    tile_b = 256
    batch_p = _round_up(max(batch, 8), 8)
    if batch_p > tile_b:
        batch_p = _round_up(batch_p, tile_b)
    else:
        tile_b = batch_p
    grid = (batch_p // tile_b,)

    # Activations in bf16 (f32 accumulation inside the kernel).
    xp = jnp.pad(x.astype(jnp.bfloat16),
                 ((0, batch_p - batch), (0, in_p - in_features)))

    def const_spec(shape):
        # Constant block index -> weights/biases stay resident across batch tiles.
        return pl.BlockSpec(shape, lambda i: (0, 0))

    flops = 2 * batch_p * (in_p * h1_p + h1_p * h2_p + h2_p * out_p)
    bytes_accessed = (xp.size * xp.dtype.itemsize
                      + sum(p.size * p.dtype.itemsize for p in padded_params)
                      + batch_p * out_p * 4)

    out_padded = pl.pallas_call(
        dqn_mlp_kernel,
        out_shape=jax.ShapeDtypeStruct((batch_p, out_p), jnp.float32),
        grid_spec=pltpu.PrefetchScalarGridSpec(
            num_scalar_prefetch=0,
            grid=grid,
            in_specs=[
                pl.BlockSpec((tile_b, in_p), lambda i: (i, 0)),
                const_spec(w1.shape), const_spec(b1.shape),
                const_spec(w2.shape), const_spec(b2.shape),
                const_spec(w3.shape), const_spec(b3.shape),
            ],
            out_specs=pl.BlockSpec((tile_b, out_p), lambda i: (i, 0)),
        ),
        compiler_params=pltpu.CompilerParams(
            dimension_semantics=("parallel",)),
        cost_estimate=pl.CostEstimate(
            flops=flops, transcendentals=0, bytes_accessed=bytes_accessed),
    )(xp, w1, b1, w2, b2, w3, b3)

    # Slice the real batch rows / output columns back out (padding is zeros).
    return out_padded[:batch, :output_size]


def reference_forward(x, params):
    w1, b1, w2, b2, w3, b3 = params
    h1 = jnp.maximum(x @ w1 + b1, 0.0)
    h2 = jnp.maximum(h1 @ w2 + b2, 0.0)
    return h2 @ w3 + b3


# TODO(synk): the Adam optimizer and save_model/load_model methods of DQNNet are
# training/serialization utilities, not part of the forward pass, and are not
# translated to Pallas.

if __name__ == "__main__":
    batch, input_size, output_size = 2, 8, 4
    key = jax.random.PRNGKey(0)
    k_x, k_p = jax.random.split(key)

    x = jax.random.normal(k_x, (batch, input_size), dtype=jnp.float32)
    params = init_params(k_p, input_size, output_size)
    padded_params = prepare_params(params)   # pad + bf16 cast, done once

    out = dqn_forward(x, padded_params, output_size)
    out = jax.block_until_ready(out)

    ref = reference_forward(x, params)
    assert out.shape == (batch, output_size)
    # bf16 matmul inputs (f32 accumulation) vs full-f32 reference.
    assert jnp.allclose(out, ref, atol=5e-2, rtol=5e-2), "mismatch vs reference"

    print("KERNEL_OK")
</pallas_src>

<mosaic_0001>
module attributes {stable_mosaic.version = 11 : i64} {
  func.func @dqn_mlp_kernel(%arg0: i32, %arg1: memref<8x128xbf16, #tpu.memory_space<vmem>>, %arg2: memref<128x512xbf16, #tpu.memory_space<vmem>>, %arg3: memref<1x512xf32, #tpu.memory_space<vmem>>, %arg4: memref<512x384xbf16, #tpu.memory_space<vmem>>, %arg5: memref<1x384xf32, #tpu.memory_space<vmem>>, %arg6: memref<384x128xbf16, #tpu.memory_space<vmem>>, %arg7: memref<1x128xf32, #tpu.memory_space<vmem>>, %arg8: memref<8x128xf32, #tpu.memory_space<vmem>>) attributes {dimension_semantics = [#tpu.dimension_semantics<parallel>], iteration_bounds = array<i64: 1>, scalar_prefetch = 0 : i64, scratch_operands = 0 : i64, tpu.core_type = #tpu.core_type<tc>, window_params = [{transform_indices = @transform_0, window_bounds = array<i64: 8, 128>}, {pipeline_mode = #tpu.pipeline_mode<synchronous>, transform_indices = @transform_1, window_bounds = array<i64: 128, 512>}, {pipeline_mode = #tpu.pipeline_mode<synchronous>, transform_indices = @transform_2, window_bounds = array<i64: 1, 512>}, {pipeline_mode = #tpu.pipeline_mode<synchronous>, transform_indices = @transform_3, window_bounds = array<i64: 512, 384>}, {pipeline_mode = #tpu.pipeline_mode<synchronous>, transform_indices = @transform_4, window_bounds = array<i64: 1, 384>}, {pipeline_mode = #tpu.pipeline_mode<synchronous>, transform_indices = @transform_5, window_bounds = array<i64: 384, 128>}, {pipeline_mode = #tpu.pipeline_mode<synchronous>, transform_indices = @transform_6, window_bounds = array<i64: 1, 128>}, {transform_indices = @transform_7, window_bounds = array<i64: 8, 128>}]} {
    %c0 = arith.constant 0 : index
    %c0_0 = arith.constant 0 : index
    %0 = vector.load %arg1[%c0, %c0_0] : memref<8x128xbf16, #tpu.memory_space<vmem>>, vector<8x128xbf16>
    %c0_1 = arith.constant 0 : index
    %c0_2 = arith.constant 0 : index
    %1 = vector.load %arg2[%c0_1, %c0_2] : memref<128x512xbf16, #tpu.memory_space<vmem>>, vector<128x512xbf16>
    %cst = arith.constant dense<0.000000e+00> : vector<8x512xf32>
    %2 = tpu.matmul %0, %1, %cst {dimension_numbers = #tpu.dot_dimension_numbers<[1], [0], [0], [1], [0, 0, 1, 1], [], []>} : vector<8x128xbf16>, vector<128x512xbf16>, vector<8x512xf32> -> vector<8x512xf32>
    %c0_3 = arith.constant 0 : index
    %c0_4 = arith.constant 0 : index
    %3 = vector.load %arg3[%c0_3, %c0_4] : memref<1x512xf32, #tpu.memory_space<vmem>>, vector<1x512xf32>
    %4 = vector.broadcast %3 : vector<1x512xf32> to vector<8x512xf32>
    %5 = arith.addf %2, %4 : vector<8x512xf32>
    %cst_5 = arith.constant 0.000000e+00 : f32
    %6 = vector.broadcast %cst_5 : f32 to vector<8x512xf32>
    %7 = arith.maximumf %5, %6 : vector<8x512xf32>
    %8 = arith.truncf %7 : vector<8x512xf32> to vector<8x512xbf16>
    %c0_6 = arith.constant 0 : index
    %c0_7 = arith.constant 0 : index
    %9 = vector.load %arg4[%c0_6, %c0_7] : memref<512x384xbf16, #tpu.memory_space<vmem>>, vector<512x384xbf16>
    %cst_8 = arith.constant dense<0.000000e+00> : vector<8x384xf32>
    %10 = tpu.matmul %8, %9, %cst_8 {dimension_numbers = #tpu.dot_dimension_numbers<[1], [0], [0], [1], [0, 0, 1, 1], [], []>} : vector<8x512xbf16>, vector<512x384xbf16>, vector<8x384xf32> -> vector<8x384xf32>
    %c0_9 = arith.constant 0 : index
    %c0_10 = arith.constant 0 : index
    %11 = vector.load %arg5[%c0_9, %c0_10] : memref<1x384xf32, #tpu.memory_space<vmem>>, vector<1x384xf32>
    %12 = vector.broadcast %11 : vector<1x384xf32> to vector<8x384xf32>
    %13 = arith.addf %10, %12 : vector<8x384xf32>
    %cst_11 = arith.constant 0.000000e+00 : f32
    %14 = vector.broadcast %cst_11 : f32 to vector<8x384xf32>
    %15 = arith.maximumf %13, %14 : vector<8x384xf32>
    %16 = arith.truncf %15 : vector<8x384xf32> to vector<8x384xbf16>
    %c0_12 = arith.constant 0 : index
    %c0_13 = arith.constant 0 : index
    %17 = vector.load %arg6[%c0_12, %c0_13] : memref<384x128xbf16, #tpu.memory_space<vmem>>, vector<384x128xbf16>
    %cst_14 = arith.constant dense<0.000000e+00> : vector<8x128xf32>
    %18 = tpu.matmul %16, %17, %cst_14 {dimension_numbers = #tpu.dot_dimension_numbers<[1], [0], [0], [1], [0, 0, 1, 1], [], []>} : vector<8x384xbf16>, vector<384x128xbf16>, vector<8x128xf32> -> vector<8x128xf32>
    %c0_15 = arith.constant 0 : index
    %c0_16 = arith.constant 0 : index
    %19 = vector.load %arg7[%c0_15, %c0_16] : memref<1x128xf32, #tpu.memory_space<vmem>>, vector<1x128xf32>
    %20 = vector.broadcast %19 : vector<1x128xf32> to vector<8x128xf32>
    %21 = arith.addf %18, %20 : vector<8x128xf32>
    %c0_17 = arith.constant 0 : index
    %c0_18 = arith.constant 0 : index
    %22 = vector.load %arg8[%c0_17, %c0_18] : memref<8x128xf32, #tpu.memory_space<vmem>>, vector<8x128xf32>
    tpu.vector_store %arg8[%c0_17, %c0_18], %21 {strides = array<i32>} : memref<8x128xf32, #tpu.memory_space<vmem>>, vector<8x128xf32>,
    return
  }
  func.func @transform_0(%arg0: i32) -> (i32, i32) {
    %c0_i32 = arith.constant 0 : i32
    %c0_i32_0 = arith.constant 0 : i32
    return %arg0, %c0_i32 : i32, i32
  }
  func.func @transform_1(%arg0: i32) -> (i32, i32) {
    %c0_i32 = arith.constant 0 : i32
    %c0_i32_0 = arith.constant 0 : i32
    %c0_i32_1 = arith.constant 0 : i32
    return %c0_i32, %c0_i32_0 : i32, i32
  }
  func.func @transform_2(%arg0: i32) -> (i32, i32) {
    %c0_i32 = arith.constant 0 : i32
    %c0_i32_0 = arith.constant 0 : i32
    %c0_i32_1 = arith.constant 0 : i32
    return %c0_i32, %c0_i32_0 : i32, i32
  }
  func.func @transform_3(%arg0: i32) -> (i32, i32) {
    %c0_i32 = arith.constant 0 : i32
    %c0_i32_0 = arith.constant 0 : i32
    %c0_i32_1 = arith.constant 0 : i32
    return %c0_i32, %c0_i32_0 : i32, i32
  }
  func.func @transform_4(%arg0: i32) -> (i32, i32) {
    %c0_i32 = arith.constant 0 : i32
    %c0_i32_0 = arith.constant 0 : i32
    %c0_i32_1 = arith.constant 0 : i32
    return %c0_i32, %c0_i32_0 : i32, i32
  }
  func.func @transform_5(%arg0: i32) -> (i32, i32) {
    %c0_i32 = arith.constant 0 : i32
    %c0_i32_0 = arith.constant 0 : i32
    %c0_i32_1 = arith.constant 0 : i32
    return %c0_i32, %c0_i32_0 : i32, i32
  }
  func.func @transform_6(%arg0: i32) -> (i32, i32) {
    %c0_i32 = arith.constant 0 : i32
    %c0_i32_0 = arith.constant 0 : i32
    %c0_i32_1 = arith.constant 0 : i32
    return %c0_i32, %c0_i32_0 : i32, i32
  }
  func.func @transform_7(%arg0: i32) -> (i32, i32) {
    %c0_i32 = arith.constant 0 : i32
    %c0_i32_0 = arith.constant 0 : i32
    return %arg0, %c0_i32 : i32, i32
  }
}

</mosaic_0001>

<bundles_post_ra>
// kernel: tpu_custom_call.1
= control target key start
LH: loop header
LB: loop body
LE: loop exit
PB: predicated region body
PF: predicated region fallthrough
CT: control target
= control target key end

     0   :  { %12 = vsyncpa [#allocation3], 0  ;;  %s2241_s0 = inlined_call_operand.hbm [shape: bf16[8,128], index: 0, kind: input, shape index: {}]   ;;  %s2242_s1 = inlined_call_operand.hbm [shape: bf16[128,512], index: 1, kind: input, shape index: {}]   ;;  %s2243_s2 = inlined_call_operand.vmem [shape: f32[1,512], index: 2, kind: input, shape index: {}]   ;;  %s2244_s3 = inlined_call_operand.hbm [shape: bf16[512,384], index: 3, kind: input, shape index: {}]   ;;  %s2245_s4 = inlined_call_operand.vmem [shape: f32[1,384], index: 4, kind: input, shape index: {}]   ;;  %s2246_s5 = inlined_call_operand.hbm [shape: bf16[384,128], index: 5, kind: input, shape index: {}]   ;;  %s2247_s6 = inlined_call_operand.vmem [shape: f32[1,128], index: 6, kind: input, shape index: {}]   ;;  %s2248_s7 = inlined_call_operand.hbm [shape: f32[8,128], index: 7, kind: output, shape index: {}]  }
   0x1   :  { %13 = vsyncpa [#allocation6], 0 }
   0x2   :  { %14 = vsyncpa [#allocation9], 0 }
   0x3   :  { %15 = vsyncpa [#allocation4], 0  ;;  %s2094_s24 = smov [#allocation5]   ;;  %s1976_s28 = scalar_lea.hbm %s2242_s1, 4096 }
   0x4   :  { %s31_s25 = sshll.u32 %s2094_s24, 4  ;;  %p1977_p0 = scmp.ne.s32.totalorder %s2242_s1, %s1976_s28  ;;  %s32_s25 = int_to_ptr.vmem [resolvable:$true] %s31_s25 }
   0x5   :  { %p1980_p1 = scmp.lt.u32.totalorder %s1976_s28, %s2242_s1 }
   0x7   :  { %p1982_p2 = pnand %p1980_p1, %p1977_p0 }
   0x9   :  { %1985 = shalt.err (!%p1982_p2)
}
   0xa   :  { %s1986_s10 = scalar_lea.vmem %s32_s25, 4096  ;;  %p1991_p4 = scmp.lt.s32.totalorder %s32_s25, %s32_s25 }
   0xb   :  { %p1987_p3 = scmp.ne.s32.totalorder %s32_s25, %s1986_s10  ;;  %p1992_p5 = scmp.lt.s32.totalorder %s1986_s10, %s1986_s10 }
   0xd   :  { %p1993_p6 = por %p1992_p5, %p1991_p4 }
   0xf   :  { %p1994_p7 = pnand %p1993_p6, %p1987_p3 }
  0x11   :  { %1997 = shalt.err (!%p1994_p7)
}
  0x12   :  { %s2095_s11 = smov 256   ;;  %s2096_s12 = smov 16  }
  0x13   :  { %37 = dma.hbm_to_vmem [thread:$0]  %s2242_s1, 4096, %s32_s25, [#allocation6], %s2095_s11, %s2095_s11, %s2096_s12  }
  0x14   :  { %s2097_s15 = smov [#allocation2]   ;;  %s2098_s17 = smov [#allocation7]  }
  0x15   :  { %s22_s16 = sshll.u32 %s2097_s15, 4  ;;  %s45_s18 = sshll.u32 %s2098_s17, 4  ;;  %s23_s16 = int_to_ptr.vmem [resolvable:$true] %s22_s16  ;;  %s46_s18 = int_to_ptr.vmem [resolvable:$true] %s45_s18 }
  0x16   :  { %s1998_s21 = scalar_lea.hbm %s2241_s0, 64 }
  0x17   :  { %p1999_p8 = scmp.ne.s32.totalorder %s2241_s0, %s1998_s21  ;;  %p2002_p9 = scmp.lt.u32.totalorder %s1998_s21, %s2241_s0 }
  0x19   :  { %p2004_p10 = pnand %p2002_p9, %p1999_p8 }
  0x1b   :  { %2007 = shalt.err (!%p2004_p10)
}
  0x1c   :  { %s2008_s1 = scalar_lea.vmem %s23_s16, 64  ;;  %p2013_p12 = scmp.lt.s32.totalorder %s23_s16, %s23_s16 }
  0x1d   :  { %p2009_p11 = scmp.ne.s32.totalorder %s23_s16, %s2008_s1  ;;  %p2014_p13 = scmp.lt.s32.totalorder %s2008_s1, %s2008_s1 }
  0x1f   :  { %p2015_p0 = por %p2014_p13, %p2013_p12 }
  0x21   :  { %p2016_p1 = pnand %p2015_p0, %p2009_p11 }
  0x23   :  { %2019 = shalt.err (!%p2016_p1)
}
  0x24   :  { %25 = dma.hbm_to_vmem [thread:$0]  %s2241_s0, 64, %s23_s16, [#allocation3]  }
  0x25   :  { %s2020_s30 = scalar_lea.hbm %s2244_s3, 12288 }
  0x26   :  { %p2021_p2 = scmp.ne.s32.totalorder %s2244_s3, %s2020_s30  ;;  %p2024_p3 = scmp.lt.u32.totalorder %s2020_s30, %s2244_s3 }
  0x28   :  { %p2026_p4 = pnand %p2024_p3, %p2021_p2 }
  0x2a   :  { %2029 = shalt.err (!%p2026_p4)
}
  0x2b   :  { %s2030_s12 = scalar_lea.vmem %s46_s18, 12288  ;;  %p2035_p6 = scmp.lt.s32.totalorder %s46_s18, %s46_s18 }
  0x2c   :  { %p2031_p5 = scmp.ne.s32.totalorder %s46_s18, %s2030_s12  ;;  %p2036_p7 = scmp.lt.s32.totalorder %s2030_s12, %s2030_s12 }
  0x2e   :  { %p2037_p8 = por %p2036_p7, %p2035_p6 }
  0x30   :  { %p2038_p9 = pnand %p2037_p8, %p2031_p5 }
  0x32   :  { %2041 = shalt.err (!%p2038_p9)
}
  0x33   :  { %s2099_s0 = smov 192   ;;  %s2100_s13 = smov 12  }
  0x34   :  { %51 = dma.hbm_to_vmem [thread:$0]  %s2244_s3, 12288, %s46_s18, [#allocation6], %s2099_s0, %s2099_s0, %s2100_s13  }
  0x35   :  { %s2101_s16 = smov [#allocation8]   ;;  %s2042_s21 = scalar_lea.hbm %s2246_s5, 3072 }
  0x36   :  { %s59_s17 = sshll.u32 %s2101_s16, 4  ;;  %p2043_p10 = scmp.ne.s32.totalorder %s2246_s5, %s2042_s21  ;;  %s60_s17 = int_to_ptr.vmem [resolvable:$true] %s59_s17 }
  0x37   :  { %p2046_p11 = scmp.lt.u32.totalorder %s2042_s21, %s2246_s5 }
  0x39   :  { %p2048_p12 = pnand %p2046_p11, %p2043_p10 }
  0x3b   :  { %2051 = shalt.err (!%p2048_p12)
}
  0x3c   :  { %s2052_s1 = scalar_lea.vmem %s60_s17, 3072  ;;  %p2057_p0 = scmp.lt.s32.totalorder %s60_s17, %s60_s17 }
  0x3d   :  { %p2053_p13 = scmp.ne.s32.totalorder %s60_s17, %s2052_s1  ;;  %p2058_p1 = scmp.lt.s32.totalorder %s2052_s1, %s2052_s1 }
  0x3f   :  { %p2059_p2 = por %p2058_p1, %p2057_p0 }
  0x41   :  { %p2060_p3 = pnand %p2059_p2, %p2053_p13 }
  0x43   :  { %2063 = shalt.err (!%p2060_p3)
}
  0x44   :  { %s2102_s3 = smov 64   ;;  %s2103_s18 = smov 4  }
  0x45   :  { %65 = dma.hbm_to_vmem [thread:$0]  %s2246_s5, 3072, %s60_s17, [#allocation9], %s2102_s3, %s2102_s3, %s2103_s18  }
  0x46   :  { %2086 = dma.done.wait [#allocation3], 64  }
  0x47   :  { %2087 = vsyncadd [#allocation3], 4294967232 }
  0x48   :  { %2088 = dma.done.wait [#allocation6], 16384  }
  0x49   :  { %2089 = vsyncadd [#allocation6], 4294950912 }
  0x4a   :  { %2090 = dma.done.wait [#allocation9], 3072  }
  0x4b   :  { %2091 = vsyncadd [#allocation9], 4294964224  ;;  %v2104_v0 = vmov 0   ;;  %v1776_v1 = vld [vmem:[#allocation5 + $0x4] ss:$16 sps:$4 sm:$0xff]   ;;  %vm2106_vm0 = vmmov 0  }
  0x4c   :  { %328 = vmatprep.mubr.bf16.mxu0 %v2104_v0  ;;  %369 = vmatprep.mubr.bf16.mxu1 %v2104_v0  ;;  %v1778_v2 = vld [vmem:[#allocation5] ss:$16 sps:$4 sm:$0xff]   ;;  %v1779_v3 = vld [vmem:[#allocation5 + $0x24] ss:$16 sps:$4 sm:$0xff]   ;;  %v1800_v10 = vld [vmem:[#allocation5 + $0xc] ss:$16 sps:$4 sm:$0xff]  }
  0x4d   :  { %296 = vmatprep.subr.bf16.mxu0 %v1776_v1  ;;  %v1781_v4 = vld [vmem:[#allocation5 + $0x20] ss:$16 sps:$4 sm:$0xff]   ;;  %v1782_v5 = vld [vmem:[#allocation5 + $0x44] ss:$16 sps:$4 sm:$0xff]   ;;  %v1802_v11 = vld [vmem:[#allocation5 + $0x8] ss:$16 sps:$4 sm:$0xff]   ;;  %337 = vmatprep.subr.bf16.mxu1 %v1800_v10 }
  0x4e   :  { %297 = vmatpush1.bf16.msra.mxu0 %v1778_v2  ;;  %v1784_v6 = vld [vmem:[#allocation5 + $0x40] ss:$16 sps:$4 sm:$0xff]   ;;  %v1785_v7 = vld [vmem:[#allocation5 + $0x64] ss:$16 sps:$4 sm:$0xff]   ;;  %v1803_v12 = vld [vmem:[#allocation5 + $0x2c] ss:$16 sps:$4 sm:$0xff]   ;;  %338 = vmatpush1.bf16.msra.mxu1 %v1802_v11 }
  0x4f   :  { %298 = vmatprep.subr.bf16.mxu0 %v1779_v3  ;;  %v1787_v8 = vld [vmem:[#allocation5 + $0x60] ss:$16 sps:$4 sm:$0xff]   ;;  %v1788_v9 = vld [vmem:[#allocation5 + $0x84] ss:$16 sps:$4 sm:$0xff]   ;;  %v1805_v14 = vld [vmem:[#allocation5 + $0x28] ss:$16 sps:$4 sm:$0xff]   ;;  %339 = vmatprep.subr.bf16.mxu1 %v1803_v12 }
  0x50   :  { %v1790_v13 = vld [vmem:[#allocation5 + $0x80] ss:$16 sps:$4 sm:$0xff]   ;;  %v1806_v15 = vld [vmem:[#allocation5 + $0x4c] ss:$16 sps:$4 sm:$0xff]   ;;  %v1791_v16 = vld [vmem:[#allocation5 + $0xa4] ss:$16 sps:$4 sm:$0xff]  }
  0x51   :  { %v1793_v17 = vld [vmem:[#allocation5 + $0xa0] ss:$16 sps:$4 sm:$0xff]   ;;  %v1808_v18 = vld [vmem:[#allocation5 + $0x48] ss:$16 sps:$4 sm:$0xff]   ;;  %v1809_v19 = vld [vmem:[#allocation5 + $0x6c] ss:$16 sps:$4 sm:$0xff]  }
  0x52   :  { %299 = vmatpush1.bf16.msra.mxu0 %v1781_v4  ;;  %340 = vmatpush1.bf16.msra.mxu1 %v1805_v14  ;;  %v1794_v20 = vld [vmem:[#allocation5 + $0xc4] ss:$16 sps:$4 sm:$0xff]   ;;  %v1796_v21 = vld [vmem:[#allocation5 + $0xc0] ss:$16 sps:$4 sm:$0xff]   ;;  %v1811_v22 = vld [vmem:[#allocation5 + $0x68] ss:$16 sps:$4 sm:$0xff]  }
  0x53   :  { %300 = vmatprep.subr.bf16.mxu0 %v1782_v5  ;;  %341 = vmatprep.subr.bf16.mxu1 %v1806_v15  ;;  %v1812_v23 = vld [vmem:[#allocation5 + $0x8c] ss:$16 sps:$4 sm:$0xff]   ;;  %v1797_v24 = vld [vmem:[#allocation5 + $0xe4] ss:$16 sps:$4 sm:$0xff]   ;;  %v1799_v25 = vld [vmem:[#allocation5 + $0xe0] ss:$16 sps:$4 sm:$0xff]  }
  0x54   :  { %v1814_v26 = vld [vmem:[#allocation5 + $0x88] ss:$16 sps:$4 sm:$0xff]   ;;  %v1815_v27 = vld [vmem:[#allocation5 + $0xac] ss:$16 sps:$4 sm:$0xff]   ;;  %v1826_v28 = vld [vmem:[#allocation7 + $0x4] ss:$12 sps:$4 sm:$0xff]  }
  0x55   :  { %v81_v29 = vld [vmem:[#allocation2] sm:$0xf]  ;;  %v1817_v30 = vld [vmem:[#allocation5 + $0xa8] ss:$16 sps:$4 sm:$0xff]   ;;  %v1824_v32 = vld [vmem:[#allocation7] ss:$12 sps:$4 sm:$0xff]  }
  0x56   :  { %301 = vmatpush1.bf16.msra.mxu0 %v1784_v6  ;;  %342 = vmatpush1.bf16.msra.mxu1 %v1808_v18  ;;  %v1818_v31 = vld [vmem:[#allocation5 + $0xcc] ss:$16 sps:$4 sm:$0xff]   ;;  %v1820_v34 = vld [vmem:[#allocation5 + $0xc8] ss:$16 sps:$4 sm:$0xff]   ;;  %v1832_v37 = vld [vmem:[#allocation7 + $0x34] ss:$12 sps:$4 sm:$0xff]  }
  0x57   :  { %302 = vmatprep.subr.bf16.mxu0 %v1785_v7  ;;  %343 = vmatprep.subr.bf16.mxu1 %v1809_v19  ;;  %v1829_v33 = vld [vmem:[#allocation7 + $0x1c] ss:$12 sps:$4 sm:$0xff]   ;;  %v1827_v36 = vld [vmem:[#allocation7 + $0x18] ss:$12 sps:$4 sm:$0xff]   ;;  %v1856_v44 = vld [vmem:[#allocation7 + $0xe0] ss:$12 sps:$4 sm:$0xff]  }
  0x58   :  { %v1821_v35 = vld [vmem:[#allocation5 + $0xec] ss:$16 sps:$4 sm:$0xff]   ;;  %v1823_v38 = vld [vmem:[#allocation5 + $0xe8] ss:$16 sps:$4 sm:$0xff]   ;;  %v1838_v45 = vld [vmem:[#allocation7 + $0x64] ss:$12 sps:$4 sm:$0xff]  }
  0x59   :  { %v1830_v39 = vld [vmem:[#allocation7 + $0x30] ss:$12 sps:$4 sm:$0xff]   ;;  %v1851_v40 = vld [vmem:[#allocation7 + $0xc8] ss:$12 sps:$4 sm:$0xff]   ;;  %v1835_v41 = vld [vmem:[#allocation7 + $0x4c] ss:$12 sps:$4 sm:$0xff]  }
  0x5a   :  { %303 = vmatpush1.bf16.msra.mxu0 %v1787_v8  ;;  %344 = vmatpush1.bf16.msra.mxu1 %v1811_v22  ;;  %v1852_v42 = vld [vmem:[#allocation7 + $0x8] ss:$12 sps:$4 sm:$0xff]   ;;  %v1836_v46 = vld [vmem:[#allocation7 + $0x60] ss:$12 sps:$4 sm:$0xff]   ;;  %v1861_v48 = vld [vmem:[#allocation7 + $0xf8] ss:$12 sps:$4 sm:$0xff]  }
  0x5b   :  { %304 = vmatprep.subr.bf16.mxu0 %v1788_v9  ;;  %345 = vmatprep.subr.bf16.mxu1 %v1812_v23  ;;  %v1833_v43 = vld [vmem:[#allocation7 + $0x48] ss:$12 sps:$4 sm:$0xff]   ;;  %v1857_v47 = vld [vmem:[#allocation7 + $0x20] ss:$12 sps:$4 sm:$0xff]   ;;  %v1839_v50 = vld [vmem:[#allocation7 + $0x78] ss:$12 sps:$4 sm:$0xff]  }
  0x5c   :  { %v1841_v49 = vld [vmem:[#allocation7 + $0x7c] ss:$12 sps:$4 sm:$0xff]   ;;  %v1862_v51 = vld [vmem:[#allocation7 + $0x38] ss:$12 sps:$4 sm:$0xff]   ;;  %v1844_v53 = vld [vmem:[#allocation7 + $0x94] ss:$12 sps:$4 sm:$0xff]  }
  0x5d   :  { %v1866_v52 = vld [vmem:[#allocation7 + $0x110] ss:$12 sps:$4 sm:$0xff]   ;;  %v1871_v56 = vld [vmem:[#allocation7 + $0x128] ss:$12 sps:$4 sm:$0xff]   ;;  %v1847_v57 = vld [vmem:[#allocation7 + $0xac] ss:$12 sps:$4 sm:$0xff]  }
  0x5e   :  { %305 = vmatpush1.bf16.msra.mxu0 %v1790_v13  ;;  %346 = vmatpush1.bf16.msra.mxu1 %v1814_v26  ;;  %v1867_v54 = vld [vmem:[#allocation7 + $0x50] ss:$12 sps:$4 sm:$0xff]   ;;  %v1872_v58 = vld [vmem:[#allocation7 + $0x68] ss:$12 sps:$4 sm:$0xff]   ;;  %v1876_v60 = vld [vmem:[#allocation7 + $0x140] ss:$12 sps:$4 sm:$0xff]  }
  0x5f   :  { %306 = vmatprep.subr.bf16.mxu0 %v1791_v16  ;;  %347 = vmatprep.subr.bf16.mxu1 %v1815_v27  ;;  %v1842_v55 = vld [vmem:[#allocation7 + $0x90] ss:$12 sps:$4 sm:$0xff]   ;;  %v1845_v59 = vld [vmem:[#allocation7 + $0xa8] ss:$12 sps:$4 sm:$0xff]   ;;  %v1877_v62 = vld [vmem:[#allocation7 + $0x80] ss:$12 sps:$4 sm:$0xff]  }
  0x60   :  { %v1850_v61 = vld [vmem:[#allocation7 + $0xc4] ss:$12 sps:$4 sm:$0xff]   ;;  %v1848_v63 = vld [vmem:[#allocation7 + $0xc0] ss:$12 sps:$4 sm:$0xff]   ;;  %v1855_v0 = vld [vmem:[#allocation7 + $0xdc] ss:$12 sps:$4 sm:$0xff]  }
  0x61   :  { %v1853_v1 = vld [vmem:[#allocation7 + $0xd8] ss:$12 sps:$4 sm:$0xff]   ;;  %v1860_v2 = vld [vmem:[#allocation7 + $0xf4] ss:$12 sps:$4 sm:$0xff]   ;;  %v1858_v3 = vld [vmem:[#allocation7 + $0xf0] ss:$12 sps:$4 sm:$0xff]  }
  0x62   :  { %307 = vmatpush1.bf16.msra.mxu0 %v1793_v17  ;;  %348 = vmatpush1.bf16.msra.mxu1 %v1817_v30  ;;  %v1865_v4 = vld [vmem:[#allocation7 + $0x10c] ss:$12 sps:$4 sm:$0xff]   ;;  %v1863_v5 = vld [vmem:[#allocation7 + $0x108] ss:$12 sps:$4 sm:$0xff]   ;;  %v1870_v6 = vld [vmem:[#allocation7 + $0x124] ss:$12 sps:$4 sm:$0xff]  }
  0x63   :  { %308 = vmatprep.subr.bf16.mxu0 %v1794_v20  ;;  %349 = vmatprep.subr.bf16.mxu1 %v1818_v31  ;;  %v1868_v7 = vld [vmem:[#allocation7 + $0x120] ss:$12 sps:$4 sm:$0xff]   ;;  %v1875_v8 = vld [vmem:[#allocation7 + $0x13c] ss:$12 sps:$4 sm:$0xff]   ;;  %v1873_v9 = vld [vmem:[#allocation7 + $0x138] ss:$12 sps:$4 sm:$0xff]   ;;  %v116_v20 = vlaneseq }
  0x64   :  { %v1880_v10 = vld [vmem:[#allocation7 + $0x154] ss:$12 sps:$4 sm:$0xff]   ;;  %v1881_v11 = vld [vmem:[#allocation7 + $0x158] ss:$12 sps:$4 sm:$0xff]   ;;  %v1878_v12 = vld [vmem:[#allocation7 + $0x150] ss:$12 sps:$4 sm:$0xff]  }
  0x65   :  { %v1882_v13 = vld [vmem:[#allocation7 + $0x98] ss:$12 sps:$4 sm:$0xff]   ;;  %v1886_v15 = vld [vmem:[#allocation7 + $0x170] ss:$12 sps:$4 sm:$0xff]   ;;  %v1883_v16 = vld [vmem:[#allocation7 + $0x168] ss:$12 sps:$4 sm:$0xff]  }
  0x66   :  { %309 = vmatpush1.bf16.msra.mxu0 %v1796_v21  ;;  %350 = vmatpush1.bf16.msra.mxu1 %v1820_v34  ;;  %v1885_v14 = vld [vmem:[#allocation7 + $0x16c] ss:$12 sps:$4 sm:$0xff]   ;;  %v1887_v17 = vld [vmem:[#allocation7 + $0xb0] ss:$12 sps:$4 sm:$0xff]   ;;  %v1891_v19 = vld [vmem:[#allocation7 + $0x248] ss:$12 sps:$4 sm:$0xff]  }
  0x67   :  { %310 = vmatprep.subr.bf16.mxu0 %v1797_v24  ;;  %351 = vmatprep.subr.bf16.mxu1 %v1821_v35  ;;  %v1890_v18 = vld [vmem:[#allocation7 + $0x184] ss:$12 sps:$4 sm:$0xff]   ;;  %v2196_v21 = vshrl.u32 %v116_v20, 7  ;;  %v2202_v23 = vld [vmem:[%s2243_s2] sm:$0xf]  ;;  %s2107_s8 = smov [#allocation10]  }
  0x68   :  { %v1931_v20 = vld [vmem:[#allocation7 + $0x258] ss:$12 sps:$4 sm:$0xff]   ;;  %s1497_s9 = sshll.u32 %s2107_s8, 4  ;;  %s1498_s9 = int_to_ptr.vmem [resolvable:$true] %s1497_s9 }
  0x69   :  { %v118_v22 = vsub.s32 0, %v2196_v21  ;;  %v122_v24 = vsub.s32 1, %v2196_v21  ;;  %v130_v35 = vsub.s32 3, %v2196_v21  ;;  %s2064_s10 = scalar_lea.vmem %s1498_s9, 128  ;;  %p2069_p5 = scmp.lt.s32.totalorder %s1498_s9, %s1498_s9 }
  0x6a   :  { %311 = vmatpush1.bf16.msra.mxu0 %v1799_v25  ;;  %352 = vmatpush1.bf16.msra.mxu1 %v1823_v38  ;;  %v1892_v38 = vld [vmem:[#allocation7 + $0x188] ss:$12 sps:$4 sm:$0xff]   ;;  %p2065_p4 = scmp.ne.s32.totalorder %s1498_s9, %s2064_s10  ;;  %p2070_p6 = scmp.lt.s32.totalorder %s2064_s10, %s2064_s10 }
  0x6b   :  { %1043 = vmatprep.subr.bf16.mxu0 %v1826_v28  ;;  %1661 = vmatprep.subr.bf16.mxu1 %v1851_v40  ;;  %v119_v25 = vrot.slane %v2202_v23, %v118_v22  ;;  %v123_v26 = vrot.slane %v2202_v23, %v122_v24  ;;  %v1895_v40 = vld [vmem:[#allocation7 + $0x19c] ss:$12 sps:$4 sm:$0xff]  }
  0x6c   :  { %p2071_p7 = por %p2070_p6, %p2069_p5 }
  0x6d   :  { %329 = vmatmul.mubr.bf16.vlgmr.msra.gmra.mrb[0].mxu0 %v81_v29  ;;  %370 = vmatmul.mubr.bf16.vlgmr.msra.gmra.mrb[0].mxu1 %v81_v29 }
  0x6e   :  { %1044 = vmatpush1.bf16.msra.mxu0 %v1824_v32  ;;  %1662 = vmatpush3.bf16.msra.mxu1 %v1852_v42  ;;  %v131_v42 = vrot.slane %v2202_v23, %v130_v35  ;;  %v1949_v35 = vld [vmem:[#allocation7 + $0x2e8] ss:$12 sps:$4 sm:$0xff]   ;;  %p2072_p8 = pnand %p2071_p7, %p2065_p4 }
  0x6f   :  { %1045 = vmatprep.subr.bf16.mxu0 %v1829_v33  ;;  %1663 = vmatprep.subr.bf16.mxu1 %v1856_v44  ;;  %v1897_v44 = vld [vmem:[#allocation7 + $0x1a0] ss:$12 sps:$4 sm:$0xff]  }
  0x72   :  { %1046 = vmatpush1.bf16.msra.mxu0 %v1827_v36  ;;  %1664 = vmatpush3.bf16.msra.mxu1 %v1857_v47 }
  0x73   :  { %1047 = vmatprep.subr.bf16.mxu0 %v1832_v37  ;;  %1665 = vmatprep.subr.bf16.mxu1 %v1861_v48  ;;  %v1888_v37 = vld [vmem:[#allocation7 + $0x180] ss:$12 sps:$4 sm:$0xff]  }
  0x76   :  { %1048 = vmatpush1.bf16.msra.mxu0 %v1830_v39  ;;  %1666 = vmatpush3.bf16.msra.mxu1 %v1862_v51  ;;  %v1898_v51 = vld [vmem:[#allocation7 + $0x1b0] ss:$12 sps:$4 sm:$0xff]  }
  0x77   :  { %1049 = vmatprep.subr.bf16.mxu0 %v1835_v41  ;;  %1667 = vmatprep.subr.bf16.mxu1 %v1866_v52  ;;  %v1896_v41 = vld [vmem:[#allocation7 + $0x260] ss:$12 sps:$4 sm:$0xff]   ;;  %v1902_v52 = vld [vmem:[#allocation7 + $0x1b8] ss:$12 sps:$4 sm:$0xff]  }
  0x7a   :  { %1050 = vmatpush1.bf16.msra.mxu0 %v1833_v43  ;;  %1668 = vmatpush3.bf16.msra.mxu1 %v1867_v54  ;;  %v1893_v43 = vld [vmem:[#allocation7 + $0x198] ss:$12 sps:$4 sm:$0xff]  }
  0x7b   :  { %1051 = vmatprep.subr.bf16.mxu0 %v1838_v45  ;;  %1669 = vmatprep.subr.bf16.mxu1 %v1871_v56  ;;  %v1900_v45 = vld [vmem:[#allocation7 + $0x1b4] ss:$12 sps:$4 sm:$0xff]   ;;  %v1905_v54 = vld [vmem:[#allocation7 + $0x1cc] ss:$12 sps:$4 sm:$0xff]  }
  0x7e   :  { %1052 = vmatpush1.bf16.msra.mxu0 %v1836_v46  ;;  %1670 = vmatpush3.bf16.msra.mxu1 %v1872_v58  ;;  %v1901_v46 = vld [vmem:[#allocation7 + $0x278] ss:$12 sps:$4 sm:$0xff]   ;;  %v1903_v58 = vld [vmem:[#allocation7 + $0x1c8] ss:$12 sps:$4 sm:$0xff]  }
  0x7f   :  { %1053 = vmatprep.subr.bf16.mxu0 %v1841_v49  ;;  %1671 = vmatprep.subr.bf16.mxu1 %v1876_v60  ;;  %v1910_v60 = vld [vmem:[#allocation7 + $0x1e4] ss:$12 sps:$4 sm:$0xff]  }
  0x82   :  { %1054 = vmatpush1.bf16.msra.mxu0 %v1839_v50  ;;  %1672 = vmatpush3.bf16.msra.mxu1 %v1877_v62  ;;  %v126_v62 = vsub.s32 2, %v2196_v21  ;;  %v1970_v21 = vld [vmem:[#allocation8 + $0x90] sm:$0xff]  }
  0x83   :  { %1055 = vmatprep.subr.bf16.mxu0 %v1844_v53  ;;  %1673 = vmatprep.subr.bf16.mxu1 %v1881_v11  ;;  %v1925_v11 = vld [vmem:[#allocation7 + $0x22c] ss:$12 sps:$4 sm:$0xff]  }
  0x86   :  { %1056 = vmatpush1.bf16.msra.mxu0 %v1842_v55  ;;  %1674 = vmatpush3.bf16.msra.mxu1 %v1882_v13  ;;  %v1906_v55 = vld [vmem:[#allocation7 + $0x290] ss:$12 sps:$4 sm:$0xff]  }
  0x87   :  { %1057 = vmatprep.subr.bf16.mxu0 %v1847_v57  ;;  %1675 = vmatprep.subr.bf16.mxu1 %v1886_v15  ;;  %v1927_v15 = vld [vmem:[#allocation7 + $0x230] ss:$12 sps:$4 sm:$0xff]  }
  0x8a   :  { %1058 = vmatpush1.bf16.msra.mxu0 %v1845_v59  ;;  %1676 = vmatpush3.bf16.msra.mxu1 %v1887_v17  ;;  %v1907_v59 = vld [vmem:[#allocation7 + $0x1d0] ss:$12 sps:$4 sm:$0xff]  }
  0x8b   :  { %1059 = vmatprep.subr.bf16.mxu0 %v1850_v61  ;;  %1683 = vmatprep.subr.bf16.mxu1 %v1891_v19  ;;  %v1911_v61 = vld [vmem:[#allocation7 + $0x2a8] ss:$12 sps:$4 sm:$0xff]  }
  0x8c   :  { %v1933_v19 = vld [vmem:[#allocation7 + $0x25c] ss:$12 sps:$4 sm:$0xff]  }
  0x8e   :  { %1060 = vmatpush1.bf16.msra.mxu0 %v1848_v63  ;;  %v1908_v63 = vld [vmem:[#allocation7 + $0x1e0] ss:$12 sps:$4 sm:$0xff]  }
  0x8f   :  { %1061 = vmatprep.subr.bf16.mxu0 %v1855_v0  ;;  %v1912_v0 = vld [vmem:[#allocation7 + $0x1e8] ss:$12 sps:$4 sm:$0xff]  }
  0x92   :  { %1062 = vmatpush1.bf16.msra.mxu0 %v1853_v1  ;;  %v1915_v1 = vld [vmem:[#allocation7 + $0x1fc] ss:$12 sps:$4 sm:$0xff]  }
  0x93   :  { %1063 = vmatprep.subr.bf16.mxu0 %v1860_v2  ;;  %v1916_v2 = vld [vmem:[#allocation7 + $0x2c0] ss:$12 sps:$4 sm:$0xff]  }
  0x96   :  { %1064 = vmatpush1.bf16.msra.mxu0 %v1858_v3  ;;  %v127_v3 = vrot.slane %v2202_v23, %v126_v62  ;;  %v1936_v23 = vld [vmem:[#allocation7 + $0x274] ss:$12 sps:$4 sm:$0xff]  }
  0x97   :  { %1065 = vmatprep.subr.bf16.mxu0 %v1865_v4  ;;  %v1913_v4 = vld [vmem:[#allocation7 + $0x1f8] ss:$12 sps:$4 sm:$0xff]  }
  0x9a   :  { %1066 = vmatpush1.bf16.msra.mxu0 %v1863_v5  ;;  %v1917_v5 = vld [vmem:[#allocation7 + $0x200] ss:$12 sps:$4 sm:$0xff]  }
  0x9b   :  { %1067 = vmatprep.subr.bf16.mxu0 %v1870_v6  ;;  %v1920_v6 = vld [vmem:[#allocation7 + $0x214] ss:$12 sps:$4 sm:$0xff]  }
  0x9e   :  { %1068 = vmatpush1.bf16.msra.mxu0 %v1868_v7  ;;  %v1921_v7 = vld [vmem:[#allocation7 + $0x2d8] ss:$12 sps:$4 sm:$0xff]  }
  0x9f   :  { %1069 = vmatprep.subr.bf16.mxu0 %v1875_v8 }
  0xa2   :  { %1070 = vmatpush1.bf16.msra.mxu0 %v1873_v9  ;;  %v1918_v9 = vld [vmem:[#allocation7 + $0x210] ss:$12 sps:$4 sm:$0xff]  }
  0xa3   :  { %1071 = vmatprep.subr.bf16.mxu0 %v1880_v10  ;;  %v1922_v10 = vld [vmem:[#allocation7 + $0x218] ss:$12 sps:$4 sm:$0xff]  }
  0xa6   :  { %1072 = vmatpush1.bf16.msra.mxu0 %v1878_v12  ;;  %v1926_v12 = vld [vmem:[#allocation7 + $0x2f0] ss:$12 sps:$4 sm:$0xff]  }
  0xa7   :  { %1073 = vmatprep.subr.bf16.mxu0 %v1885_v14  ;;  %v1923_v14 = vld [vmem:[#allocation7 + $0x228] ss:$12 sps:$4 sm:$0xff]  }
  0xaa   :  { %1074 = vmatpush1.bf16.msra.mxu0 %v1883_v16  ;;  %v1930_v16 = vld [vmem:[#allocation7 + $0x244] ss:$12 sps:$4 sm:$0xff]  }
  0xab   :  { %1084 = vmatprep.subr.bf16.mxu0 %v1890_v18  ;;  %v1928_v18 = vld [vmem:[#allocation7 + $0x240] ss:$12 sps:$4 sm:$0xff]  }
 0x140   :  { %v330_v27 = vpop.f32.mrb[0].mxu0  ;;  %v371_v47 = vpop.f32.mrb[0].mxu1 }
 0x141   :  { %v331_v28 = vadd.f32 %v330_v27, %v119_v25  ;;  %v332_v29 = vpop.f32.mrb[1].mxu0  ;;  %v373_v48 = vpop.f32.mrb[1].mxu1  ;;  %v372_v8 = vadd.f32 %v371_v47, %v127_v3  ;;  %v1934_v25 = vld [vmem:[#allocation7 + $0x270] ss:$12 sps:$4 sm:$0xff]   ;;  %v1937_v27 = vld [vmem:[#allocation7 + $0x288] ss:$12 sps:$4 sm:$0xff]  }
 0x142   :  { %v333_v30 = vadd.f32 %v332_v29, %v123_v26  ;;  %v334_v31 = vpop.f32.mrb[2].mxu0  ;;  %v374_v49 = vadd.f32 %v373_v48, %v131_v42  ;;  %v375_v50 = vpop.f32.mrb[2].mxu1  ;;  %v1939_v26 = vld [vmem:[#allocation7 + $0x28c] ss:$12 sps:$4 sm:$0xff]   ;;  %v1964_v48 = vld [vmem:[#allocation8 + $0x70] sm:$0xff]  }
 0x143   :  { %v378_v32 = vmax.f32 %v331_v28, 0.0  ;;  %v335_v33 = vpop.f32.mrb[3].mxu0  ;;  %v376_v53 = vpop.f32.mrb[3].mxu1  ;;  %v380_v13 = vmax.f32 %v372_v8, 0.0  ;;  %v1942_v28 = vld [vmem:[#allocation7 + $0x2a4] ss:$12 sps:$4 sm:$0xff]  }
 0x144   :  { %v379_v34 = vmax.f32 %v333_v30, 0.0  ;;  %v381_v56 = vmax.f32 %v374_v49, 0.0  ;;  %v1940_v29 = vld [vmem:[#allocation7 + $0x2a0] ss:$12 sps:$4 sm:$0xff]   ;;  %v1945_v30 = vld [vmem:[#allocation7 + $0x2bc] ss:$12 sps:$4 sm:$0xff]  }
 0x145   :  { %v382_v39 = vpack.c.bf16 %v378_v32, %v378_v32  ;;  %v384_v17 = vpack.c.bf16 %v380_v13, %v380_v13  ;;  %v1943_v31 = vld [vmem:[#allocation7 + $0x2b8] ss:$12 sps:$4 sm:$0xff]   ;;  %v1948_v32 = vld [vmem:[#allocation7 + $0x2d4] ss:$12 sps:$4 sm:$0xff]   ;;  %v1946_v33 = vld [vmem:[#allocation7 + $0x2d0] ss:$12 sps:$4 sm:$0xff]  }
 0x146   :  { %v383_v36 = vpack.c.bf16 %v379_v34, %v379_v34  ;;  %v385_v57 = vpack.c.bf16 %v381_v56, %v381_v56  ;;  %v1951_v34 = vld [vmem:[#allocation7 + $0x2ec] ss:$12 sps:$4 sm:$0xff]   ;;  %v1965_v49 = vld [vmem:[#allocation8 + $0x30] sm:$0xff]  }
 0x147   :  { %v1958_v42 = vld [vmem:[#allocation8 + $0x58] sm:$0xff]   ;;  %v1963_v47 = vld [vmem:[#allocation8 + $0x28] sm:$0xff]  }
 0x148   :  { %1075 = vmatprep.mubr.bf16.mxu0 %v383_v36  ;;  %1157 = vmatprep.mubr.bf16.mxu1 %v383_v36  ;;  %v1952_v36 = vld [vmem:[#allocation8 + $0x40] sm:$0xff]   ;;  %v1966_v50 = vld [vmem:[#allocation8 + $0x78] sm:$0xff]  }
 0x149   :  { %1076 = vmatmul.mubr.bf16.vlgmr.msra.gmra.mrb[4].mxu0 %v382_v39  ;;  %1158 = vmatmul.mubr.bf16.vlgmr.msra.gmra.mrb[4].mxu1 %v382_v39  ;;  %v1955_v39 = vld [vmem:[#allocation8 + $0x8] sm:$0xff]  }
 0x14a   :  { %1085 = vmatpush1.bf16.msra.mxu0 %v1888_v37  ;;  %1684 = vmatpush3.bf16.msra.mxu1 %v1892_v38  ;;  %v1953_v37 = vld [vmem:[#allocation8] sm:$0xff]   ;;  %v1954_v38 = vld [vmem:[#allocation8 + $0x48] sm:$0xff]  }
 0x14b   :  { %1086 = vmatprep.subr.bf16.mxu0 %v1895_v40  ;;  %1685 = vmatprep.subr.bf16.mxu1 %v1896_v41  ;;  %v1956_v40 = vld [vmem:[#allocation8 + $0x50] sm:$0xff]  }
 0x14c   :  { %1197 = vmatprep.mubr.bf16.mxu1 %v385_v57  ;;  %1116 = vmatprep.mubr.bf16.mxu0 %v385_v57  ;;  %v1957_v41 = vld [vmem:[#allocation8 + $0x10] sm:$0xff]  }
 0x14e   :  { %1087 = vmatpush1.bf16.msra.mxu0 %v1893_v43  ;;  %1686 = vmatpush3.bf16.msra.mxu1 %v1897_v44  ;;  %v1959_v43 = vld [vmem:[#allocation8 + $0x18] sm:$0xff]   ;;  %v1960_v44 = vld [vmem:[#allocation8 + $0x60] sm:$0xff]  }
 0x14f   :  { %1088 = vmatprep.subr.bf16.mxu0 %v1900_v45  ;;  %1687 = vmatprep.subr.bf16.mxu1 %v1901_v46  ;;  %v1961_v45 = vld [vmem:[#allocation8 + $0x20] sm:$0xff]   ;;  %v1962_v46 = vld [vmem:[#allocation8 + $0x68] sm:$0xff]  }
 0x152   :  { %1089 = vmatpush1.bf16.msra.mxu0 %v1898_v51  ;;  %1688 = vmatpush3.bf16.msra.mxu1 %v1902_v52  ;;  %v1967_v51 = vld [vmem:[#allocation8 + $0x38] sm:$0xff]   ;;  %v2105_v52 = vmov 0.0  }
 0x153   :  { %1090 = vmatprep.subr.bf16.mxu0 %v1905_v54  ;;  %1689 = vmatprep.subr.bf16.mxu1 %v1906_v55 }
 0x156   :  { %1091 = vmatpush1.bf16.msra.mxu0 %v1903_v58  ;;  %1690 = vmatpush3.bf16.msra.mxu1 %v1907_v59  ;;  %v514_v58 = vld [vmem:[%s2245_s4] sm:$0x7] }
 0x157   :  { %1092 = vmatprep.subr.bf16.mxu0 %v1910_v60  ;;  %1691 = vmatprep.subr.bf16.mxu1 %v1911_v61  ;;  %v527_v59 = vrot.slane %v514_v58, %v126_v62 }
 0x15a   :  { %1093 = vmatpush1.bf16.msra.mxu0 %v1908_v63  ;;  %1692 = vmatpush3.bf16.msra.mxu1 %v1912_v0 }
 0x15b   :  { %1094 = vmatprep.subr.bf16.mxu0 %v1915_v1  ;;  %1693 = vmatprep.subr.bf16.mxu1 %v1916_v2 }
 0x15e   :  { %1095 = vmatpush1.bf16.msra.mxu0 %v1913_v4  ;;  %1694 = vmatpush3.bf16.msra.mxu1 %v1917_v5  ;;  %v519_v4 = vrot.slane %v514_v58, %v118_v22  ;;  %v523_v5 = vrot.slane %v514_v58, %v122_v24  ;;  %v1971_v22 = vld [vmem:[#allocation8 + $0x98] sm:$0xff]   ;;  %v1972_v24 = vld [vmem:[#allocation8 + $0xa0] sm:$0xff]  }
 0x15f   :  { %1096 = vmatprep.subr.bf16.mxu0 %v1920_v6  ;;  %1695 = vmatprep.subr.bf16.mxu1 %v1921_v7 }
 0x162   :  { %1097 = vmatpush1.bf16.msra.mxu0 %v1918_v9  ;;  %1696 = vmatpush3.bf16.msra.mxu1 %v1922_v10 }
 0x163   :  { %1098 = vmatprep.subr.bf16.mxu0 %v1925_v11  ;;  %1697 = vmatprep.subr.bf16.mxu1 %v1926_v12 }
 0x166   :  { %1099 = vmatpush1.bf16.msra.mxu0 %v1923_v14  ;;  %1698 = vmatpush3.bf16.msra.mxu1 %v1927_v15  ;;  %v1968_v14 = vld [vmem:[#allocation8 + $0x80] sm:$0xff]  }
 0x167   :  { %1100 = vmatprep.subr.bf16.mxu0 %v1930_v16  ;;  %1705 = vmatprep.subr.bf16.mxu1 %v1952_v36  ;;  %v1969_v16 = vld [vmem:[#allocation8 + $0x88] sm:$0xff]  }
 0x169   :  { %1198 = vmatmul.mubr.bf16.vlgmr.msra.gmra.mrb[8].mxu1 %v384_v17 }
 0x16a   :  { %1101 = vmatpush1.bf16.msra.mxu0 %v1928_v18  ;;  %1706 = vmatpush3.bf16.msra.mxu1 %v1953_v37  ;;  %v1974_v18 = vld [vmem:[#allocation8 + $0xb0] sm:$0xff]  }
 0x16b   :  { %1102 = vmatprep.subr.bf16.mxu0 %v1933_v19  ;;  %1707 = vmatprep.subr.bf16.mxu1 %v1954_v38  ;;  %v1975_v19 = vld [vmem:[#allocation8 + $0xb8] sm:$0xff]  }
 0x16e   :  { %1103 = vmatpush1.bf16.msra.mxu0 %v1931_v20  ;;  %1708 = vmatpush3.bf16.msra.mxu1 %v1955_v39 }
 0x16f   :  { %1104 = vmatprep.subr.bf16.mxu0 %v1936_v23  ;;  %1709 = vmatprep.subr.bf16.mxu1 %v1956_v40 }
 0x172   :  { %1105 = vmatpush1.bf16.msra.mxu0 %v1934_v25  ;;  %1710 = vmatpush3.bf16.msra.mxu1 %v1957_v41 }
 0x173   :  { %1106 = vmatprep.subr.bf16.mxu0 %v1939_v26  ;;  %1711 = vmatprep.subr.bf16.mxu1 %v1958_v42 }
 0x176   :  { %1107 = vmatpush1.bf16.msra.mxu0 %v1937_v27  ;;  %1712 = vmatpush3.bf16.msra.mxu1 %v1959_v43 }
 0x177   :  { %1108 = vmatprep.subr.bf16.mxu0 %v1942_v28  ;;  %1713 = vmatprep.subr.bf16.mxu1 %v1960_v44 }
 0x17a   :  { %1109 = vmatpush1.bf16.msra.mxu0 %v1940_v29  ;;  %1714 = vmatpush3.bf16.msra.mxu1 %v1961_v45 }
 0x17b   :  { %1110 = vmatprep.subr.bf16.mxu0 %v1945_v30  ;;  %1715 = vmatprep.subr.bf16.mxu1 %v1962_v46  ;;  %v1636_v30 = vld [vmem:[%s2247_s6] ss:$0 sm:$0xff] }
 0x17e   :  { %1111 = vmatpush1.bf16.msra.mxu0 %v1943_v31  ;;  %1716 = vmatpush3.bf16.msra.mxu1 %v1963_v47 }
 0x17f   :  { %1112 = vmatprep.subr.bf16.mxu0 %v1948_v32  ;;  %1717 = vmatprep.subr.bf16.mxu1 %v1964_v48 }
 0x182   :  { %1113 = vmatpush1.bf16.msra.mxu0 %v1946_v33  ;;  %1718 = vmatpush3.bf16.msra.mxu1 %v1965_v49 }
 0x183   :  { %1114 = vmatprep.subr.bf16.mxu0 %v1951_v34  ;;  %1719 = vmatprep.subr.bf16.mxu1 %v1966_v50 }
 0x186   :  { %1115 = vmatpush1.bf16.msra.mxu0 %v1949_v35  ;;  %1720 = vmatpush3.bf16.msra.mxu1 %v1967_v51 }
 0x187   :  { %1736 = vmatprep.subr.bf16.mxu1 %v2105_v52 }
 0x189   :  { %1117 = vmatmul.mubr.bf16.vlgmr.msra.gmra.mrb[4].mxu0 %v384_v17  ;;  %v1973_v17 = vld [vmem:[#allocation8 + $0xa8] sm:$0xff]  }
 0x21c   :  { %v1677_v53 = vpop.f32.mrb[4].mxu1 }
 0x21d   :  { %v1678_v54 = vpop.f32.mrb[5].mxu1 }
 0x21e   :  { %v1679_v55 = vadd.f32 %v1678_v54, %v1677_v53  ;;  %v1680_v56 = vpop.f32.mrb[6].mxu1 }
 0x21f   :  { %v1681_v57 = vpop.f32.mrb[7].mxu1 }
 0x220   :  { %v1160_v63 = vadd.f32 %v1679_v55, %v527_v59 }
 0x23c   :  { %v1699_v60 = vpop.f32.mrb[8].mxu1 }
 0x23d   :  { %v1700_v61 = vpop.f32.mrb[9].mxu1 }
 0x23e   :  { %v1701_v0 = vadd.f32 %v1700_v61, %v1699_v60  ;;  %v1702_v1 = vpop.f32.mrb[10].mxu1 }
 0x23f   :  { %v1703_v2 = vpop.f32.mrb[11].mxu1 }
 0x240   :  { %v1200_v3 = vadd.f32 %v1701_v0, %v1160_v63 }
 0x242   :  { %v1207_v20 = vmax.f32 %v1200_v3, 0.0 }
 0x244   :  { %v1210_v23 = vpack.c.bf16 %v1207_v20, %v1207_v20 }
 0x25c   :  { %v1118_v6 = vpop.f32.mrb[4].mxu0 }
 0x25d   :  { %v1756_v7 = vadd.f32 %v1118_v6, %v519_v4  ;;  %v1120_v8 = vpop.f32.mrb[5].mxu0 }
 0x25e   :  { %v1757_v9 = vadd.f32 %v1120_v8, %v523_v5  ;;  %v1122_v10 = vpop.f32.mrb[6].mxu0 }
 0x25f   :  { %v1205_v11 = vmax.f32 %v1756_v7, 0.0  ;;  %v1123_v62 = vpop.f32.mrb[7].mxu0 }
 0x260   :  { %v1206_v12 = vmax.f32 %v1757_v9, 0.0 }
 0x261   :  { %v1208_v15 = vpack.c.bf16 %v1205_v11, %v1205_v11 }
 0x262   :  { %v1209_v13 = vpack.c.bf16 %v1206_v12, %v1206_v12 }
 0x264   :  { %1442 = vmatprep.mubr.bf16.mxu1 %v1209_v13 }
 0x265   :  { %1443 = vmatmul.mubr.bf16.vlgmr.msra.gmra.mrb[12].mxu1 %v1208_v15 }
 0x266   :  { %1737 = vmatpush3.bf16.msra.mxu1 %v1968_v14  ;;  %1752 = vmatprep.mubr.msk.bf16.mxu1 %vm2106_vm0, %v2105_v52 }
 0x267   :  { %1738 = vmatprep.subr.bf16.mxu1 %v2105_v52 }
 0x26a   :  { %1739 = vmatpush3.bf16.msra.mxu1 %v1969_v16 }
 0x26b   :  { %1740 = vmatprep.subr.bf16.mxu1 %v2105_v52 }
 0x26e   :  { %1741 = vmatpush3.bf16.msra.mxu1 %v1970_v21 }
 0x26f   :  { %1742 = vmatprep.subr.bf16.mxu1 %v2105_v52 }
 0x272   :  { %1743 = vmatpush3.bf16.msra.mxu1 %v1971_v22 }
 0x273   :  { %1744 = vmatprep.subr.bf16.mxu1 %v2105_v52 }
 0x276   :  { %1745 = vmatpush3.bf16.msra.mxu1 %v1972_v24 }
 0x277   :  { %1746 = vmatprep.subr.bf16.mxu1 %v2105_v52 }
 0x27a   :  { %1747 = vmatpush3.bf16.msra.mxu1 %v1973_v17 }
 0x27b   :  { %1748 = vmatprep.subr.bf16.mxu1 %v2105_v52 }
 0x27e   :  { %1749 = vmatpush3.bf16.msra.mxu1 %v1974_v18 }
 0x27f   :  { %1750 = vmatprep.subr.bf16.mxu1 %v2105_v52 }
 0x282   :  { %1751 = vmatpush3.bf16.msra.mxu1 %v1975_v19 }
 0x285   :  { %1753 = vmatmul.mubr.bf16.vlgmr.msra.gmra.mrb[16].mxu1 %v1210_v23 }
 0x338   :  { %v1721_v25 = vpop.f32.mrb[12].mxu1 }
 0x339   :  { %v1722_v26 = vpop.f32.mrb[13].mxu1 }
 0x33a   :  { %v1723_v27 = vadd.f32 %v1722_v26, %v1721_v25  ;;  %v1724_v28 = vpop.f32.mrb[14].mxu1 }
 0x33b   :  { %v1725_v29 = vpop.f32.mrb[15].mxu1 }
 0x33c   :  { %v1445_v31 = vadd.f32 %v1723_v27, %v1636_v30 }
 0x358   :  { %v1484_v32 = vpop.f32.mrb[16].mxu1 }
 0x359   :  { %v1485_v33 = vadd.f32 %v1484_v32, %v1445_v31  ;;  %v1754_v34 = vpop.f32.mrb[17].mxu1 }
 0x35a   :  { %v1487_v35 = vpop.f32.mrb[18].mxu1 }
 0x35b   :  { %1490 = vst [vmem:[#allocation10] sm:$0xff] %v1485_v33  ;;  %v1755_v36 = vpop.f32.mrb[19].mxu1 }
 0x35c   :  { %2075 = shalt.err (!%p2072_p8)
}
 0x35d   :  { %s2076_s6 = scalar_lea.hbm %s2248_s7, 128 }
 0x35e   :  { %p2077_p9 = scmp.ne.s32.totalorder %s2248_s7, %s2076_s6  ;;  %p2080_p10 = scmp.lt.u32.totalorder %s2076_s6, %s2248_s7 }
 0x360   :  { %p2082_p11 = pnand %p2080_p10, %p2077_p9 }
 0x362   :  { %2085 = shalt.err (!%p2082_p11)
}
 0x363   :  { %1500 = dma.vmem_to_hbm [thread:$0]  %s1498_s9, 128, %s2248_s7, [#allocation4]  }
 0x364   :  { %2092 = dma.done.wait [#allocation4], 128  }
 0x365   :  { %2093 = vsyncadd [#allocation4], 4294967168 }
 0x366   :  { %1504 = vsyncpa [#allocation3], 1 }
 0x367   :  { %1505 = vsyncpa [#allocation6], 1 }
 0x368   :  { %1506 = vsyncpa [#allocation9], 1 }
 0x369   :  { %1507 = vsyncpa [#allocation4], 1 }

</bundles_post_ra>
